<compile_context>
chip_gen: v6e
topology: v6e:2x2x1
jax: 0.10.0
libtpu: 0.0.40
codegen_flags: <defaults>
</compile_context>

<pallas_src>
import functools

import jax
import jax.numpy as jnp
from jax.experimental import pallas as pl
from jax.experimental.pallas import tpu as pltpu


def _round_up(x, m):
    return ((x + m - 1) // m) * m


def _mlp_edge_kernel(xs_ref, xd_ref, w1a_ref, w1b_ref, b1_ref,
                     w2_ref, b2_ref, w3_ref, b3_ref, o_ref):
    # xs_ref, xd_ref : (TE, F)  gathered src/dst node features (compute dtype)
    # w1a_ref,w1b_ref: (F, F)   W1[:, :F].T and W1[:, F:].T (compute dtype)
    # w2_ref         : (F, F)   W2.T          w3_ref: (F, 2)  W3.T
    # b1/b2          : (1, F)   f32           b3:     (1, 2)  f32
    # o_ref          : (TE, 2)  f32 sigmoid scores
    cdt = w2_ref.dtype

    # Layer 1: concat(xs, xd) @ W1^T  ==  xs @ W1a^T + xd @ W1b^T  (no concat copy).
    h1 = jnp.dot(xs_ref[...], w1a_ref[...], preferred_element_type=jnp.float32)
    h1 = h1 + jnp.dot(xd_ref[...], w1b_ref[...],
                      preferred_element_type=jnp.float32)
    h1 = jnp.maximum(h1 + b1_ref[...], 0.0)

    # Layer 2.
    h2 = jnp.dot(h1.astype(cdt), w2_ref[...],
                 preferred_element_type=jnp.float32)
    h2 = jnp.maximum(h2 + b2_ref[...], 0.0)

    # Layer 3 + sigmoid. N=2 MXU pass is negligible; kernel is memory bound and the
    # output is only 8 B/edge, so the narrow store is a secondary concern.
    logits = jnp.dot(h2.astype(cdt), w3_ref[...],
                     preferred_element_type=jnp.float32)
    logits = logits + b3_ref[...]
    o_ref[...] = jax.nn.sigmoid(logits).astype(o_ref.dtype)


@functools.partial(jax.jit, static_argnames=("tile_e", "compute_dtype"))
def mlp_predictor_forward(h, src, dst, params, *, tile_e=512,
                          compute_dtype=jnp.bfloat16):
    """Compute edge scores.

    h:    [N, h_feats]  node features (f32)
    src:  [E]           edge source node indices (int32)
    dst:  [E]           edge destination node indices (int32)
    params: w1 [F, 2F], b1 [F], w2 [F, F], b2 [F], w3 [2, F], b3 [2]
            (PyTorch nn.Linear convention: weight is [out, in]).
    returns: [E, 2] f32 edge scores.
    """
    assert tile_e >= 8 and tile_e % 8 == 0, "tile_e must be a multiple of 8"
    F_ = h.shape[1]
    E = src.shape[0]

    # Effective tile: honor the request but keep >= 2 grid steps whenever E allows
    # (hides prologue/epilogue DMAs on v5e/v6e; lets v7x shard over its 2 TCs).
    half = _round_up(max(E // 2, 1), 8)
    eff_tile = max(8, min(tile_e, half))
    E_pad = _round_up(E, eff_tile)
    grid = (E_pad // eff_tile,)

    # --- glue: pad the (cheap) index arrays, gather src/dst rows in compute dtype.
    # Padded rows gather node 0; their garbage scores are sliced off at the end.
    if E_pad != E:
        src = jnp.pad(src, (0, E_pad - E))
        dst = jnp.pad(dst, (0, E_pad - E))
    h_c = h.astype(compute_dtype)
    xs = jnp.take(h_c, src, axis=0)          # [E_pad, F]
    xd = jnp.take(h_c, dst, axis=0)          # [E_pad, F]

    # Weight prep: split W1 along its input dim, pre-transpose to [in, out],
    # stream matmul operands in compute dtype; keep biases in f32 (VPU side).
    w1 = params["w1"]
    w1a = w1[:, :F_].T.astype(compute_dtype)     # [F, F]
    w1b = w1[:, F_:].T.astype(compute_dtype)     # [F, F]
    w2t = params["w2"].T.astype(compute_dtype)   # [F, F]
    w3t = params["w3"].T.astype(compute_dtype)   # [F, 2]
    b1 = params["b1"][None, :].astype(jnp.float32)   # [1, F]
    b2 = params["b2"][None, :].astype(jnp.float32)   # [1, F]
    b3 = params["b3"][None, :].astype(jnp.float32)   # [1, 2]

    out = pl.pallas_call(
        _mlp_edge_kernel,
        out_shape=jax.ShapeDtypeStruct((E_pad, 2), jnp.float32),
        grid_spec=pltpu.PrefetchScalarGridSpec(
            num_scalar_prefetch=0,
            grid=grid,
            in_specs=[
                pl.BlockSpec((eff_tile, F_), lambda i: (i, 0)),  # xs tile
                pl.BlockSpec((eff_tile, F_), lambda i: (i, 0)),  # xd tile
                pl.BlockSpec((F_, F_), lambda i: (0, 0)),        # w1a^T
                pl.BlockSpec((F_, F_), lambda i: (0, 0)),        # w1b^T
                pl.BlockSpec((1, F_), lambda i: (0, 0)),         # b1
                pl.BlockSpec((F_, F_), lambda i: (0, 0)),        # w2^T
                pl.BlockSpec((1, F_), lambda i: (0, 0)),         # b2
                pl.BlockSpec((F_, 2), lambda i: (0, 0)),         # w3^T
                pl.BlockSpec((1, 2), lambda i: (0, 0)),          # b3
            ],
            out_specs=pl.BlockSpec((eff_tile, 2), lambda i: (i, 0)),
        ),
        compiler_params=pltpu.CompilerParams(
            dimension_semantics=("parallel",)),
    )(xs, xd, w1a, w1b, b1, w2t, b2, w3t, b3)

    return out[:E]


def init_params(key, h_feats):
    """Deterministic init mirroring nn.Linear (uniform +-1/sqrt(fan_in))."""
    ks = jax.random.split(key, 6)

    def lin(kw, kb, out_f, in_f):
        bound = 1.0 / jnp.sqrt(jnp.float32(in_f))
        w = jax.random.uniform(kw, (out_f, in_f), jnp.float32, -bound, bound)
        b = jax.random.uniform(kb, (out_f,), jnp.float32, -bound, bound)
        return w, b

    w1, b1 = lin(ks[0], ks[1], h_feats, 2 * h_feats)
    w2, b2 = lin(ks[2], ks[3], h_feats, h_feats)
    w3, b3 = lin(ks[4], ks[5], 2, h_feats)
    return {"w1": w1, "b1": b1, "w2": w2, "b2": b2, "w3": w3, "b3": b3}


def _reference(h, src, dst, params):
    x = jnp.concatenate([h[src], h[dst]], axis=1)
    h1 = jnp.maximum(x @ params["w1"].T + params["b1"], 0.0)
    h2 = jnp.maximum(h1 @ params["w2"].T + params["b2"], 0.0)
    return jax.nn.sigmoid(h2 @ params["w3"].T + params["b3"])


if __name__ == "__main__":
    key = jax.random.PRNGKey(0)
    k_h, k_src, k_dst, k_param = jax.random.split(key, 4)

    h_feats = 32
    num_nodes = 16
    num_edges = 64

    h = jax.random.normal(k_h, (num_nodes, h_feats), jnp.float32)
    src = jax.random.randint(k_src, (num_edges,), 0, num_nodes, jnp.int32)
    dst = jax.random.randint(k_dst, (num_edges,), 0, num_nodes, jnp.int32)
    params = init_params(k_param, h_feats)

    ref = _reference(h, src, dst, params)

    # f32 streaming path: tight check against the pure-JAX reference.
    scores_f32 = mlp_predictor_forward(h, src, dst, params,
                                       compute_dtype=jnp.float32)
    scores_f32 = jax.block_until_ready(scores_f32)
    assert scores_f32.shape == (num_edges, 2), scores_f32.shape
    assert jnp.allclose(scores_f32, ref, atol=1e-5, rtol=1e-5), (
        float(jnp.max(jnp.abs(scores_f32 - ref))))

    # Default path (bf16 operands, f32 accumulation): small precision delta.
    scores = mlp_predictor_forward(h, src, dst, params)
    scores = jax.block_until_ready(scores)
    assert scores.shape == (num_edges, 2), scores.shape
    max_err = float(jnp.max(jnp.abs(scores - ref)))
    assert max_err < 2e-2, max_err

    print("KERNEL_OK")
</pallas_src>

<mosaic_0001>
module attributes {stable_mosaic.version = 11 : i64} {
  func.func @_mlp_edge_kernel(%arg0: i32, %arg1: memref<32x32xf32, #tpu.memory_space<vmem>>, %arg2: memref<32x32xf32, #tpu.memory_space<vmem>>, %arg3: memref<32x32xf32, #tpu.memory_space<vmem>>, %arg4: memref<32x32xf32, #tpu.memory_space<vmem>>, %arg5: memref<1x32xf32, #tpu.memory_space<vmem>>, %arg6: memref<32x32xf32, #tpu.memory_space<vmem>>, %arg7: memref<1x32xf32, #tpu.memory_space<vmem>>, %arg8: memref<32x2xf32, #tpu.memory_space<vmem>>, %arg9: memref<1x2xf32, #tpu.memory_space<vmem>>, %arg10: memref<32x2xf32, #tpu.memory_space<vmem>>) attributes {dimension_semantics = [#tpu.dimension_semantics<parallel>], iteration_bounds = array<i64: 2>, scalar_prefetch = 0 : i64, scratch_operands = 0 : i64, tpu.core_type = #tpu.core_type<tc>, window_params = [{transform_indices = @transform_0, window_bounds = array<i64: 32, 32>}, {transform_indices = @transform_1, window_bounds = array<i64: 32, 32>}, {pipeline_mode = #tpu.pipeline_mode<synchronous>, transform_indices = @transform_2, window_bounds = array<i64: 32, 32>}, {pipeline_mode = #tpu.pipeline_mode<synchronous>, transform_indices = @transform_3, window_bounds = array<i64: 32, 32>}, {pipeline_mode = #tpu.pipeline_mode<synchronous>, transform_indices = @transform_4, window_bounds = array<i64: 1, 32>}, {pipeline_mode = #tpu.pipeline_mode<synchronous>, transform_indices = @transform_5, window_bounds = array<i64: 32, 32>}, {pipeline_mode = #tpu.pipeline_mode<synchronous>, transform_indices = @transform_6, window_bounds = array<i64: 1, 32>}, {pipeline_mode = #tpu.pipeline_mode<synchronous>, transform_indices = @transform_7, window_bounds = array<i64: 32, 2>}, {pipeline_mode = #tpu.pipeline_mode<synchronous>, transform_indices = @transform_8, window_bounds = array<i64: 1, 2>}, {transform_indices = @transform_9, window_bounds = array<i64: 32, 2>}]} {
    %c0 = arith.constant 0 : index
    %c0_0 = arith.constant 0 : index
    %0 = vector.load %arg1[%c0, %c0_0] : memref<32x32xf32, #tpu.memory_space<vmem>>, vector<32x32xf32>
    %c0_1 = arith.constant 0 : index
    %c0_2 = arith.constant 0 : index
    %1 = vector.load %arg3[%c0_1, %c0_2] : memref<32x32xf32, #tpu.memory_space<vmem>>, vector<32x32xf32>
    %cst = arith.constant dense<0.000000e+00> : vector<32x32xf32>
    %2 = tpu.matmul %0, %1, %cst {dimension_numbers = #tpu.dot_dimension_numbers<[1], [0], [0], [1], [0, 0, 1, 1], [], []>} : vector<32x32xf32>, vector<32x32xf32>, vector<32x32xf32> -> vector<32x32xf32>
    %c0_3 = arith.constant 0 : index
    %c0_4 = arith.constant 0 : index
    %3 = vector.load %arg2[%c0_3, %c0_4] : memref<32x32xf32, #tpu.memory_space<vmem>>, vector<32x32xf32>
    %c0_5 = arith.constant 0 : index
    %c0_6 = arith.constant 0 : index
    %4 = vector.load %arg4[%c0_5, %c0_6] : memref<32x32xf32, #tpu.memory_space<vmem>>, vector<32x32xf32>
    %cst_7 = arith.constant dense<0.000000e+00> : vector<32x32xf32>
    %5 = tpu.matmul %3, %4, %cst_7 {dimension_numbers = #tpu.dot_dimension_numbers<[1], [0], [0], [1], [0, 0, 1, 1], [], []>} : vector<32x32xf32>, vector<32x32xf32>, vector<32x32xf32> -> vector<32x32xf32>
    %6 = arith.addf %2, %5 : vector<32x32xf32>
    %c0_8 = arith.constant 0 : index
    %c0_9 = arith.constant 0 : index
    %7 = vector.load %arg5[%c0_8, %c0_9] : memref<1x32xf32, #tpu.memory_space<vmem>>, vector<1x32xf32>
    %8 = vector.broadcast %7 : vector<1x32xf32> to vector<32x32xf32>
    %9 = arith.addf %6, %8 : vector<32x32xf32>
    %cst_10 = arith.constant 0.000000e+00 : f32
    %10 = vector.broadcast %cst_10 : f32 to vector<32x32xf32>
    %11 = arith.maximumf %9, %10 : vector<32x32xf32>
    %c0_11 = arith.constant 0 : index
    %c0_12 = arith.constant 0 : index
    %12 = vector.load %arg6[%c0_11, %c0_12] : memref<32x32xf32, #tpu.memory_space<vmem>>, vector<32x32xf32>
    %cst_13 = arith.constant dense<0.000000e+00> : vector<32x32xf32>
    %13 = tpu.matmul %11, %12, %cst_13 {dimension_numbers = #tpu.dot_dimension_numbers<[1], [0], [0], [1], [0, 0, 1, 1], [], []>} : vector<32x32xf32>, vector<32x32xf32>, vector<32x32xf32> -> vector<32x32xf32>
    %c0_14 = arith.constant 0 : index
    %c0_15 = arith.constant 0 : index
    %14 = vector.load %arg7[%c0_14, %c0_15] : memref<1x32xf32, #tpu.memory_space<vmem>>, vector<1x32xf32>
    %15 = vector.broadcast %14 : vector<1x32xf32> to vector<32x32xf32>
    %16 = arith.addf %13, %15 : vector<32x32xf32>
    %cst_16 = arith.constant 0.000000e+00 : f32
    %17 = vector.broadcast %cst_16 : f32 to vector<32x32xf32>
    %18 = arith.maximumf %16, %17 : vector<32x32xf32>
    %c0_17 = arith.constant 0 : index
    %c0_18 = arith.constant 0 : index
    %19 = vector.load %arg8[%c0_17, %c0_18] : memref<32x2xf32, #tpu.memory_space<vmem>>, vector<32x2xf32>
    %cst_19 = arith.constant dense<0.000000e+00> : vector<32x2xf32>
    %20 = tpu.matmul %18, %19, %cst_19 {dimension_numbers = #tpu.dot_dimension_numbers<[1], [0], [0], [1], [0, 0, 1, 1], [], []>} : vector<32x32xf32>, vector<32x2xf32>, vector<32x2xf32> -> vector<32x2xf32>
    %c0_20 = arith.constant 0 : index
    %c0_21 = arith.constant 0 : index
    %21 = vector.load %arg9[%c0_20, %c0_21] : memref<1x2xf32, #tpu.memory_space<vmem>>, vector<1x2xf32>
    %22 = vector.broadcast %21 : vector<1x2xf32> to vector<32x2xf32>
    %23 = arith.addf %20, %22 : vector<32x2xf32>
    %24 = arith.negf %23 : vector<32x2xf32>
    %25 = math.exp %24 : vector<32x2xf32>
    %cst_22 = arith.constant 1.000000e+00 : f32
    %26 = vector.broadcast %cst_22 : f32 to vector<32x2xf32>
    %27 = arith.addf %26, %25 : vector<32x2xf32>
    %28 = arith.divf %26, %27 : vector<32x2xf32>
    %c0_23 = arith.constant 0 : index
    %c0_24 = arith.constant 0 : index
    %29 = vector.load %arg10[%c0_23, %c0_24] : memref<32x2xf32, #tpu.memory_space<vmem>>, vector<32x2xf32>
    tpu.vector_store %arg10[%c0_23, %c0_24], %28 {strides = array<i32>} : memref<32x2xf32, #tpu.memory_space<vmem>>, vector<32x2xf32>,
    return
  }
  func.func @transform_0(%arg0: i32) -> (i32, i32) {
    %c0_i32 = arith.constant 0 : i32
    %c0_i32_0 = arith.constant 0 : i32
    return %arg0, %c0_i32 : i32, i32
  }
  func.func @transform_1(%arg0: i32) -> (i32, i32) {
    %c0_i32 = arith.constant 0 : i32
    %c0_i32_0 = arith.constant 0 : i32
    return %arg0, %c0_i32 : i32, i32
  }
  func.func @transform_2(%arg0: i32) -> (i32, i32) {
    %c0_i32 = arith.constant 0 : i32
    %c0_i32_0 = arith.constant 0 : i32
    %c0_i32_1 = arith.constant 0 : i32
    return %c0_i32, %c0_i32_0 : i32, i32
  }
  func.func @transform_3(%arg0: i32) -> (i32, i32) {
    %c0_i32 = arith.constant 0 : i32
    %c0_i32_0 = arith.constant 0 : i32
    %c0_i32_1 = arith.constant 0 : i32
    return %c0_i32, %c0_i32_0 : i32, i32
  }
  func.func @transform_4(%arg0: i32) -> (i32, i32) {
    %c0_i32 = arith.constant 0 : i32
    %c0_i32_0 = arith.constant 0 : i32
    %c0_i32_1 = arith.constant 0 : i32
    return %c0_i32, %c0_i32_0 : i32, i32
  }
  func.func @transform_5(%arg0: i32) -> (i32, i32) {
    %c0_i32 = arith.constant 0 : i32
    %c0_i32_0 = arith.constant 0 : i32
    %c0_i32_1 = arith.constant 0 : i32
    return %c0_i32, %c0_i32_0 : i32, i32
  }
  func.func @transform_6(%arg0: i32) -> (i32, i32) {
    %c0_i32 = arith.constant 0 : i32
    %c0_i32_0 = arith.constant 0 : i32
    %c0_i32_1 = arith.constant 0 : i32
    return %c0_i32, %c0_i32_0 : i32, i32
  }
  func.func @transform_7(%arg0: i32) -> (i32, i32) {
    %c0_i32 = arith.constant 0 : i32
    %c0_i32_0 = arith.constant 0 : i32
    %c0_i32_1 = arith.constant 0 : i32
    return %c0_i32, %c0_i32_0 : i32, i32
  }
  func.func @transform_8(%arg0: i32) -> (i32, i32) {
    %c0_i32 = arith.constant 0 : i32
    %c0_i32_0 = arith.constant 0 : i32
    %c0_i32_1 = arith.constant 0 : i32
    return %c0_i32, %c0_i32_0 : i32, i32
  }
  func.func @transform_9(%arg0: i32) -> (i32, i32) {
    %c0_i32 = arith.constant 0 : i32
    %c0_i32_0 = arith.constant 0 : i32
    return %arg0, %c0_i32 : i32, i32
  }
}

</mosaic_0001>

<bundles_post_ra>
// kernel: mlp_predictor_forward.1
= control target key start
LH: loop header
LB: loop body
LE: loop exit
PB: predicated region body
PF: predicated region fallthrough
CT: control target
= control target key end

     0   :  { %s1107_s30 = smov 0   ;;  %s1205_s0 = inlined_call_operand.vmem [shape: f32[64,32], index: 0, kind: input, shape index: {}]   ;;  %s1206_s1 = inlined_call_operand.vmem [shape: f32[64,32], index: 1, kind: input, shape index: {}]   ;;  %s1207_s2 = inlined_call_operand.vmem [shape: f32[32,32], index: 2, kind: input, shape index: {}]   ;;  %s1208_s3 = inlined_call_operand.vmem [shape: f32[32,32], index: 3, kind: input, shape index: {}]   ;;  %s1209_s4 = inlined_call_operand.vmem [shape: f32[1,32], index: 4, kind: input, shape index: {}]   ;;  %s1210_s5 = inlined_call_operand.vmem [shape: f32[32,32], index: 5, kind: input, shape index: {}]   ;;  %s1211_s6 = inlined_call_operand.vmem [shape: f32[1,32], index: 6, kind: input, shape index: {}]   ;;  %s1212_s7 = inlined_call_operand.vmem [shape: f32[32,2], index: 7, kind: input, shape index: {}]   ;;  %s1213_s8 = inlined_call_operand.vmem [shape: f32[1,2], index: 8, kind: input, shape index: {}]   ;;  %s1214_s9 = inlined_call_operand.vmem [shape: f32[64,2], index: 9, kind: output, shape index: {}]  }
   0x1 LB: > { %s901_s10 = sadd.s32 4294967295, %s1055_s30   ;;  %p905_p0 = scmp.ge.s32.totalorder %s1055_s30, 1  ;;  %s1055_s30 = sphi %s1107_s30, %s19_s30  }
   0x2   : > { %p299_p1 = scmp.lt.s32.totalorder %s1055_s30, 3 }
   0x4   : > { %p300_p2 = pnand %p905_p0, %p299_p1 }
   0x5   : > { %s906_s17 = sshll.u32 (!%p300_p2), %s901_s10, 2 }
   0x6   : > { %303 = sbr.rel (%p300_p2) target bundleno = 659 (0x293), region = 56  ;;  %p341_p3 = scmp.lt.s32.totalorder (!%p300_p2), %s906_s17, 7 }
   0xb   : > { %v373_v0 = vld [vmem:[%s1208_s3 + $0x18] sm:$0xff]  ;;  %v372_v2 = vld [vmem:[%s1208_s3 + $0x10] sm:$0xff]  ;;  %v371_v4 = vld [vmem:[%s1208_s3 + $0x8] sm:$0xff]  ;;  %s1216_s17 = smov (!%p341_p3, %s906_s17), 7  ;;  %vm374_vm0 = vcmask 261120   ;;  %vm828_vm1 = vcmask 15360  }
   0xc   : > { %v365_v1 = vld [vmem:[%s1207_s2 + $0x18] sm:$0xff]  ;;  %969 = vmatprep.subr.mxu0 %v373_v0  ;;  %v364_v3 = vld [vmem:[%s1207_s2 + $0x10] sm:$0xff]  ;;  %v363_v5 = vld [vmem:[%s1207_s2 + $0x8] sm:$0xff]  ;;  %s1139_s28 = sshll.u32 %s1216_s17, 3 }
   0xd   : > { %983 = vmatprep.subr.mxu1 %v365_v1  ;;  %970 = vmatpush3.msra.mxu0 %v373_v0  ;;  %v370_v6 = vld [vmem:[%s1208_s3] sm:$0xff]  ;;  %s350_s11 = scalar_lea.vmem %s1206_s1, %s1139_s28  ;;  %s344_s14 = scalar_lea.vmem %s1205_s0, %s1139_s28  ;;  %v587_v16 = vld [vmem:[%s1210_s5 + $0x18] sm:$0xff]  ;;  %v586_v17 = vld [vmem:[%s1210_s5 + $0x10] sm:$0xff] }
   0xe   : > { %984 = vmatpush3.msra.mxu1 %v365_v1  ;;  %971 = vmatprep.subr.mxu0 %v372_v2  ;;  %v362_v7 = vld [vmem:[%s1207_s2] sm:$0xff]  ;;  %v367_v9 = vld [vmem:[%s350_s11 + $0x8] sm:$0xff]  ;;  %v368_v10 = vld [vmem:[%s350_s11 + $0x10] sm:$0xff]  ;;  %s356_s20 = scalar_lea.vmem %s1214_s9, %s1139_s28 }
   0xf   : > { %985 = vmatprep.subr.mxu1 %v364_v3  ;;  %972 = vmatpush3.msra.mxu0 %v372_v2  ;;  %v366_v8 = vld [vmem:[%s350_s11] sm:$0xff]  ;;  %v359_v12 = vld [vmem:[%s344_s14 + $0x8] sm:$0xff]  ;;  %v360_v13 = vld [vmem:[%s344_s14 + $0x10] sm:$0xff] }
  0x10   : > { %986 = vmatpush3.msra.mxu1 %v364_v3  ;;  %973 = vmatprep.subr.mxu0 %v371_v4  ;;  %v358_v11 = vld [vmem:[%s344_s14] sm:$0xff]  ;;  %v369_v14 = vld [vmem:[%s350_s11 + $0x18] sm:$0xff]  ;;  %v585_v18 = vld [vmem:[%s1210_s5 + $0x8] sm:$0xff] }
  0x11   : > { %987 = vmatprep.subr.mxu1 %v363_v5  ;;  %974 = vmatpush3.msra.mxu0 %v371_v4  ;;  %v361_v15 = vld [vmem:[%s344_s14 + $0x18] sm:$0xff]  ;;  %v584_v19 = vld [vmem:[%s1210_s5] sm:$0xff]  ;;  %v698_v42 = vld [vmem:[%s1212_s7 + $0x10] sm:$0xff] }
  0x12   : > { %988 = vmatpush3.msra.mxu1 %v363_v5  ;;  %975 = vmatprep.subr.mxu0 %v370_v6  ;;  %v699_v20 = vld [vmem:[%s1212_s7 + $0x18] sm:$0xff]  ;;  %v920_v24 = vld [vmem:[%s1209_s4] ss:$0 sm:$0xff]  ;;  %v697_v43 = vld [vmem:[%s1212_s7 + $0x8] sm:$0xff] }
  0x13   : > { %989 = vmatprep.subr.mxu1 %v362_v7  ;;  %976 = vmatpush3.msra.mxu0 %v370_v6  ;;  %v696_v44 = vld [vmem:[%s1212_s7] sm:$0xff] }
  0x14   : > { %977 = vmatprep.mubr.msk.f32.mxu0 %vm374_vm0, %v366_v8  ;;  %990 = vmatpush3.msra.mxu1 %v362_v7  ;;  %v921_v45 = vld [vmem:[%s1211_s6] ss:$0 sm:$0xff] }
  0x15   : > { %991 = vmatprep.mubr.msk.f32.mxu1 %vm374_vm0, %v358_v11  ;;  %978 = vmatmul.mubr.msk.f32.vlgmr.msra.gmra.mxu0 %vm374_vm0, %v367_v9  ;;  %v926_v58 = vld [vmem:[%s1213_s8] ss:$0 sm:$0xff] }
  0x16   : > { %992 = vmatmul.mubr.msk.f32.vlgmr.msra.gmra.mxu1 %vm374_vm0, %v359_v12  ;;  %980 = vmatprep.mubr.msk.f32.mxu0 %vm374_vm0, %v368_v10 }
  0x17   : > { %994 = vmatprep.mubr.msk.f32.mxu1 %vm374_vm0, %v360_v13  ;;  %997 = vmatprep.subr.mxu0 %v587_v16 }
  0x18   : > { %998 = vmatpush3.msra.mxu0 %v587_v16  ;;  %1011 = vmatprep.subr.mxu1 %v699_v20 }
  0x19   : > { %981 = vmatmul.mubr.msk.f32.gmra.mxu0 %vm374_vm0, %v369_v14  ;;  %999 = vmatprep.subr.mxu0 %v586_v17 }
  0x1a   : > { %995 = vmatmul.mubr.msk.f32.gmra.mxu1 %vm374_vm0, %v361_v15  ;;  %1000 = vmatpush3.msra.mxu0 %v586_v17 }
  0x1b   : > { %1001 = vmatprep.subr.mxu0 %v585_v18  ;;  %1012 = vmatpush3.msra.mxu1 %v699_v20 }
  0x1c   : > { %1002 = vmatpush3.msra.mxu0 %v585_v18  ;;  %1013 = vmatprep.subr.mxu1 %v698_v42 }
  0x1d   : > { %1003 = vmatprep.subr.mxu0 %v584_v19  ;;  %1014 = vmatpush3.msra.mxu1 %v698_v42 }
  0x1e   : > { %1004 = vmatpush3.msra.mxu0 %v584_v19  ;;  %1015 = vmatprep.subr.mxu1 %v697_v43 }
  0x1f   : > { %1016 = vmatpush3.msra.mxu1 %v697_v43 }
  0x20   : > { %1017 = vmatprep.subr.mxu1 %v696_v44 }
  0x21   : > { %1018 = vmatpush3.msra.mxu1 %v696_v44 }
  0xd5   : > { %v979_v21 = vpop.f32.mrf.mxu0 }
  0xd6   : > { %v993_v22 = vpop.f32.mrf.mxu1 }
  0xd7   : > { %v556_v23 = vadd.f32 %v993_v22, %v979_v21  ;;  %v453_v25 = vpop.f32.mrf.mxu0 }
  0xd8   : > { %v550_v26 = vpop.f32.mrf.mxu1 }
  0xd9   : > { %v551_v27 = vadd.f32 %v550_v26, %v453_v25  ;;  %v577_v28 = vadd.f32 %v920_v24, %v556_v23  ;;  %v982_v29 = vpop.f32.mrf.mxu0 }
  0xda   : > { %v996_v30 = vpop.f32.mrf.mxu1 }
  0xdb   : > { %v576_v31 = vadd.f32 %v920_v24, %v551_v27  ;;  %v566_v32 = vadd.f32 %v996_v30, %v982_v29  ;;  %v463_v33 = vpop.f32.mrf.mxu0  ;;  %v581_v37 = vmax.f32 %v577_v28, 0.0 }
  0xdc   : > { %v560_v34 = vpop.f32.mrf.mxu1 }
  0xdd   : > { %v580_v35 = vmax.f32 %v576_v31, 0.0  ;;  %v561_v36 = vadd.f32 %v560_v34, %v463_v33  ;;  %v579_v38 = vadd.f32 %v920_v24, %v566_v32 }
  0xdf   : > { %v578_v39 = vadd.f32 %v920_v24, %v561_v36  ;;  %1005 = vmatprep.mubr.msk.f32.mxu0 %vm374_vm0, %v580_v35  ;;  %v583_v41 = vmax.f32 %v579_v38, 0.0 }
  0xe0   : > { %1006 = vmatmul.mubr.msk.f32.vlgmr.msra.gmra.mxu0 %vm374_vm0, %v581_v37 }
  0xe1   : > { %v582_v40 = vmax.f32 %v578_v39, 0.0 }
  0xe3   : > { %1008 = vmatprep.mubr.msk.f32.mxu0 %vm374_vm0, %v582_v40 }
  0xe4   : > { %1009 = vmatmul.mubr.msk.f32.gmra.mxu0 %vm374_vm0, %v583_v41 }
 0x1a0   : > { %v1007_v46 = vpop.f32.mrf.mxu0 }
 0x1a1   : > { %v679_v47 = vadd.f32 %v1007_v46, %v921_v45 }
 0x1a2   : > { %v673_v48 = vpop.f32.mrf.mxu0 }
 0x1a3   : > { %v674_v49 = vadd.f32 %v921_v45, %v673_v48  ;;  %v693_v52 = vmax.f32 %v679_v47, 0.0 }
 0x1a4   : > { %v1010_v50 = vpop.f32.mrf.mxu0 }
 0x1a5   : > { %v692_v51 = vmax.f32 %v674_v49, 0.0  ;;  %v689_v53 = vadd.f32 %v1010_v50, %v921_v45 }
 0x1a6   : > { %v683_v54 = vpop.f32.mrf.mxu0 }
 0x1a7   : > { %v684_v55 = vadd.f32 %v921_v45, %v683_v54  ;;  %1019 = vmatprep.mubr.msk.f32.mxu1 %vm374_vm0, %v692_v51  ;;  %v695_v57 = vmax.f32 %v689_v53, 0.0 }
 0x1a8   : > { %1020 = vmatmul.mubr.msk.f32.vlgmr.msra.gmra.mxu1 %vm374_vm0, %v693_v52 }
 0x1a9   : > { %v694_v56 = vmax.f32 %v684_v55, 0.0 }
 0x1ab   : > { %1022 = vmatprep.mubr.msk.f32.mxu1 %vm374_vm0, %v694_v56 }
 0x1ac   : > { %1023 = vmatmul.mubr.msk.f32.gmra.mxu1 %vm374_vm0, %v695_v57 }
 0x268   : > { %v1021_v59 = vpop.f32.mrf.mxu1 }
 0x269   : > { %v791_v60 = vadd.f32 %v1021_v59, %v926_v58 }
 0x26a   : > { %v785_v61 = vpop.f32.mrf.mxu1 }
 0x26b   : > { %v932_v62 = vmul.f32 -1.442695, %v791_v60  ;;  %v786_v63 = vadd.f32 %v926_v58, %v785_v61 }
 0x26c   : > { %v1024_v0 = vpop.f32.mrf.mxu1 }
 0x26d   : > { %1033 = vpow2.f32 %v932_v62  ;;  %v931_v1 = vmul.f32 -1.442695, %v786_v63  ;;  %v801_v2 = vadd.f32 %v1024_v0, %v926_v58 }
 0x26e   : > { %v795_v3 = vpop.f32.mrf.mxu1 }
 0x26f   : > { %1035 = vpow2.f32 %v931_v1  ;;  %v934_v4 = vmul.f32 -1.442695, %v801_v2  ;;  %v796_v5 = vadd.f32 %v926_v58, %v795_v3 }
 0x271   : > { %1037 = vpow2.f32 %v934_v4  ;;  %v933_v6 = vmul.f32 -1.442695, %v796_v5 }
 0x273   : > { %1039 = vpow2.f32 %v933_v6 }
 0x27a   : > { %v1034_v7 = vpop.eup %1033 }
 0x27b   : > { %v817_v9 = vadd.f32 1.0, %v1034_v7 }
 0x27c   : > { %v1036_v8 = vpop.eup %1035 }
 0x27d   : > { %v816_v10 = vadd.f32 1.0, %v1036_v8 }
 0x27e   : > { %v1038_v11 = vpop.eup %1037 }
 0x27f   : > { %1041 = vrcp.f32 %v816_v10  ;;  %v819_v13 = vadd.f32 1.0, %v1038_v11 }
 0x280   : > { %v1040_v12 = vpop.eup %1039  ;;  %1043 = vrcp.f32 %v817_v9 }
 0x281   : > { %v818_v14 = vadd.f32 1.0, %v1040_v12 }
 0x283   : > { %1045 = vrcp.f32 %v818_v14 }
 0x284   : > { %1047 = vrcp.f32 %v819_v13 }
 0x28c   : > { %v1042_v15 = vpop.eup %1041 }
 0x28d   : > { %v1044_v16 = vpop.eup %1043  ;;  %829 = vst.msk [vmem:[%s356_s20] sm:$0xff] %vm828_vm1, %v1042_v15 }
 0x28e   : > { %830 = vst.msk [vmem:[%s356_s20 + $0x8] sm:$0xff] %vm828_vm1, %v1044_v16 }
 0x290   : > { %v1046_v17 = vpop.eup %1045 }
 0x291   : > { %v1048_v18 = vpop.eup %1047  ;;  %831 = vst.msk [vmem:[%s356_s20 + $0x10] sm:$0xff] %vm828_vm1, %v1046_v17 }
 0x292   : > { %832 = vst.msk [vmem:[%s356_s20 + $0x18] sm:$0xff] %vm828_vm1, %v1048_v18 }
 0x293 PF: > { %s19_s30 = sadd.s32 1, %s1055_s30  }
 0x294   : > { %p16_p4 = scmp.ge.s32.totalorder %s19_s30, 4  }
 0x296   :  { %18 = sbr.rel (!%p16_p4) target bundleno = 1 (0x1), region = 89 }

</bundles_post_ra>
